<compile_context>
chip_gen: v7x
topology: tpu7x:2x2x1
jax: 0.10.0
libtpu: 0.0.40
codegen_flags: <defaults>
</compile_context>

<pallas_src>
import jax
import jax.numpy as jnp
from jax.experimental import pallas as pl
from jax.experimental.pallas import tpu as pltpu

INPUT_SIZE = 5
OUTPUT_SIZE = 2


def linear_kernel(x_ref, w_ref, b_ref, o_ref):
    """o = x @ w + b in natural (batch-major) layout.

    x_ref: VMEM (TB, in_f)
    w_ref: VMEM (in_f, out_f)   -- tiny, padded into one MXU pass (effectively free)
    b_ref: VMEM (1, out_f)
    o_ref: VMEM (TB, out_f)
    """
    acc = jnp.dot(x_ref[...], w_ref[...], preferred_element_type=jnp.float32)
    o_ref[...] = (acc + b_ref[...].astype(jnp.float32)).astype(o_ref.dtype)


def linear_pallas(x, w, b, *, batch_tile=2048):
    """Compute x @ w + b (PyTorch nn.Linear forward) with a single Pallas kernel.

    x: (B, in_f), w: (in_f, out_f), b: (out_f,)  ->  (B, out_f)
    """
    B, in_f = x.shape
    in_f_w, out_f = w.shape
    assert in_f == in_f_w, f"weight in_features {in_f_w} != input features {in_f}"
    assert b.shape == (out_f,), f"bias shape {b.shape} != ({out_f},)"
    b2 = b.reshape(1, out_f)

    out_shape = jax.ShapeDtypeStruct((B, out_f), x.dtype)

    if B <= batch_tile or B % batch_tile != 0:
        # Small / irregular batch: one gridless call, everything in single VMEM tiles.
        return pl.pallas_call(
            linear_kernel,
            out_shape=out_shape,
            in_specs=[
                pl.BlockSpec(memory_space=pltpu.MemorySpace.VMEM),  # x
                pl.BlockSpec(memory_space=pltpu.MemorySpace.VMEM),  # w
                pl.BlockSpec(memory_space=pltpu.MemorySpace.VMEM),  # b
            ],
            out_specs=pl.BlockSpec(memory_space=pltpu.MemorySpace.VMEM),
        )(x, w, b2)

    # Large batch: pipeline (double-buffer) over the batch dimension; weights/bias stay resident.
    grid = (B // batch_tile,)
    return pl.pallas_call(
        linear_kernel,
        out_shape=out_shape,
        grid=grid,
        in_specs=[
            pl.BlockSpec((batch_tile, in_f), lambda i: (i, 0)),   # x tile
            pl.BlockSpec((in_f, out_f), lambda i: (0, 0)),        # w (full, same every step)
            pl.BlockSpec((1, out_f), lambda i: (0, 0)),           # b (full, same every step)
        ],
        out_specs=pl.BlockSpec((batch_tile, out_f), lambda i: (i, 0)),
        compiler_params=pltpu.CompilerParams(
            dimension_semantics=("parallel",)),   # lets v7x shard the batch across both TCs
    )(x, w, b2)


def init_params(key, in_features, out_features):
    # Deterministic init mimicking nn.Linear default: U(-1/sqrt(in), 1/sqrt(in))
    kw, kb = jax.random.split(key)
    bound = 1.0 / jnp.sqrt(jnp.float32(in_features))
    w = jax.random.uniform(kw, (in_features, out_features), jnp.float32, -bound, bound)
    b = jax.random.uniform(kb, (out_features,), jnp.float32, -bound, bound)
    return w, b


if __name__ == "__main__":
    key = jax.random.PRNGKey(0)
    kx, kp, kx2 = jax.random.split(key, 3)

    w, b = init_params(kp, INPUT_SIZE, OUTPUT_SIZE)

    # Small batch -> gridless single-tile path.
    batch = 128
    x = jax.random.normal(kx, (batch, INPUT_SIZE), dtype=jnp.float32)
    out = jax.block_until_ready(linear_pallas(x, w, b))
    ref = x @ w + b
    assert out.shape == (batch, OUTPUT_SIZE)
    assert jnp.allclose(out, ref, atol=1e-5, rtol=1e-5), "gridless path mismatch vs reference"

    # Larger batch -> pipelined batch-grid path (still tiny: 4096 x 5 f32 = 80 KB).
    big_batch = 4096
    x2 = jax.random.normal(kx2, (big_batch, INPUT_SIZE), dtype=jnp.float32)
    out2 = jax.block_until_ready(linear_pallas(x2, w, b))
    ref2 = x2 @ w + b
    assert out2.shape == (big_batch, OUTPUT_SIZE)
    assert jnp.allclose(out2, ref2, atol=1e-5, rtol=1e-5), "grid path mismatch vs reference"

    # TODO(synk): the PyTorch module's print() of tensor sizes / CUDA device info is host-side
    # logging with no kernel equivalent; intentionally omitted.
    print("KERNEL_OK")
</pallas_src>

<mosaic_0001>
module attributes {stable_mosaic.version = 11 : i64} {
  func.func @linear_kernel(%arg0: memref<128x5xf32, #tpu.memory_space<vmem>>, %arg1: memref<5x2xf32, #tpu.memory_space<vmem>>, %arg2: memref<1x2xf32, #tpu.memory_space<vmem>>, %arg3: memref<128x2xf32, #tpu.memory_space<vmem>>) attributes {dimension_semantics = [], scalar_prefetch = 0 : i64, scratch_operands = 0 : i64, tpu.core_type = #tpu.core_type<tc>} {
    %c0 = arith.constant 0 : index
    %c0_0 = arith.constant 0 : index
    %0 = vector.load %arg0[%c0, %c0_0] : memref<128x5xf32, #tpu.memory_space<vmem>>, vector<128x5xf32>
    %c0_1 = arith.constant 0 : index
    %c0_2 = arith.constant 0 : index
    %1 = vector.load %arg1[%c0_1, %c0_2] : memref<5x2xf32, #tpu.memory_space<vmem>>, vector<5x2xf32>
    %cst = arith.constant dense<0.000000e+00> : vector<128x2xf32>
    %2 = tpu.matmul %0, %1, %cst {dimension_numbers = #tpu.dot_dimension_numbers<[1], [0], [0], [1], [0, 0, 1, 1], [], []>} : vector<128x5xf32>, vector<5x2xf32>, vector<128x2xf32> -> vector<128x2xf32>
    %c0_3 = arith.constant 0 : index
    %c0_4 = arith.constant 0 : index
    %3 = vector.load %arg2[%c0_3, %c0_4] : memref<1x2xf32, #tpu.memory_space<vmem>>, vector<1x2xf32>
    %4 = vector.broadcast %3 : vector<1x2xf32> to vector<128x2xf32>
    %5 = arith.addf %2, %4 : vector<128x2xf32>
    %c0_5 = arith.constant 0 : index
    %c0_6 = arith.constant 0 : index
    %6 = vector.load %arg3[%c0_5, %c0_6] : memref<128x2xf32, #tpu.memory_space<vmem>>, vector<128x2xf32>
    tpu.vector_store %arg3[%c0_5, %c0_6], %5 {strides = array<i32>} : memref<128x2xf32, #tpu.memory_space<vmem>>, vector<128x2xf32>,
    return
  }
}

</mosaic_0001>

<bundles_post_ra>
// kernel: tpu_custom_call.1
= control target key start
LH: loop header
LB: loop body
LE: loop exit
PB: predicated region body
PF: predicated region fallthrough
CT: control target
= control target key end

     0   :  { %vm87_vm0 = vcmask 1044480   ;;  %vm38_vm1 = vcmask 39936   ;;  %vm236_vm2 = vcmask 15360   ;;  %s474_s1 = inlined_call_operand.vmem [shape: f32[5,2], index: 1, kind: input, shape index: {}]   ;;  %s475_s0 = inlined_call_operand.vmem [shape: f32[128,5], index: 0, kind: input, shape index: {}]   ;;  %s476_s2 = inlined_call_operand.vmem [shape: f32[1,2], index: 2, kind: input, shape index: {}]   ;;  %s477_s3 = inlined_call_operand.vmem [shape: f32[128,2], index: 3, kind: output, shape index: {}]  }
   0x1   :  { %v30_v0 = vld [vmem:[%s474_s1] sm:$0x1f]  ;;  %v15_v3 = vld [vmem:[%s475_s0 + $0x8] sm:$0xff]  ;;  %v16_v5 = vld [vmem:[%s475_s0 + $0x10] sm:$0xff] }
   0x2   :  { %v14_v1 = vld [vmem:[%s475_s0] sm:$0xff]  ;;  %292 = vmatprep.subr.msk.mxu0 %vm87_vm0, %v30_v0  ;;  %318 = vmatprep.subr.msk.mxu1 %vm87_vm0, %v30_v0  ;;  %v23_v4 = vld [vmem:[%s475_s0 + $0x48] sm:$0xff]  ;;  %v24_v6 = vld [vmem:[%s475_s0 + $0x50] sm:$0xff] }
   0x3   :  { %v22_v2 = vld [vmem:[%s475_s0 + $0x40] sm:$0xff]  ;;  %293 = vmatpush3.msk.msra.mxu0 %vm87_vm0, %v30_v0  ;;  %319 = vmatpush3.msk.msra.mxu1 %vm87_vm0, %v30_v0  ;;  %v17_v7 = vld [vmem:[%s475_s0 + $0x18] sm:$0xff]  ;;  %v19_v11 = vld [vmem:[%s475_s0 + $0x28] sm:$0xff] }
   0x4   :  { %294 = vmatprep.mubr.msk.f32.mxu0 %vm38_vm1, %v14_v1  ;;  %306 = vmatprep.mubr.msk.f32.mxu1 %vm38_vm1, %v22_v2  ;;  %v25_v8 = vld [vmem:[%s475_s0 + $0x58] sm:$0xff]  ;;  %v18_v9 = vld [vmem:[%s475_s0 + $0x20] sm:$0xff]  ;;  %v27_v12 = vld [vmem:[%s475_s0 + $0x68] sm:$0xff] }
   0x5   :  { %295 = vmatmul.mubr.msk.f32.vlgmr.msra.gmra.mrb[0].mxu0 %vm38_vm1, %v15_v3  ;;  %307 = vmatmul.mubr.msk.f32.vlgmr.msra.gmra.mrb[0].mxu1 %vm38_vm1, %v23_v4  ;;  %v26_v10 = vld [vmem:[%s475_s0 + $0x60] sm:$0xff]  ;;  %v20_v13 = vld [vmem:[%s475_s0 + $0x30] sm:$0xff]  ;;  %v21_v15 = vld [vmem:[%s475_s0 + $0x38] sm:$0xff] }
   0x6   :  { %297 = vmatprep.mubr.msk.f32.mxu0 %vm38_vm1, %v16_v5  ;;  %309 = vmatprep.mubr.msk.f32.mxu1 %vm38_vm1, %v24_v6  ;;  %v28_v14 = vld [vmem:[%s475_s0 + $0x70] sm:$0xff]  ;;  %v29_v16 = vld [vmem:[%s475_s0 + $0x78] sm:$0xff]  ;;  %v257_v17 = vld [vmem:[%s476_s2] ss:$0 sm:$0xff] }
   0x9   :  { %298 = vmatmul.mubr.msk.f32.gmra.mrb[2].mxu0 %vm38_vm1, %v17_v7  ;;  %310 = vmatmul.mubr.msk.f32.gmra.mrb[2].mxu1 %vm38_vm1, %v25_v8 }
   0xa   :  { %300 = vmatprep.mubr.msk.f32.mxu0 %vm38_vm1, %v18_v9  ;;  %312 = vmatprep.mubr.msk.f32.mxu1 %vm38_vm1, %v26_v10 }
   0xd   :  { %301 = vmatmul.mubr.msk.f32.gmra.mrb[4].mxu0 %vm38_vm1, %v19_v11  ;;  %313 = vmatmul.mubr.msk.f32.gmra.mrb[4].mxu1 %vm38_vm1, %v27_v12 }
   0xe   :  { %303 = vmatprep.mubr.msk.f32.mxu0 %vm38_vm1, %v20_v13  ;;  %315 = vmatprep.mubr.msk.f32.mxu1 %vm38_vm1, %v28_v14 }
  0x11   :  { %304 = vmatmul.mubr.msk.f32.gmra.mrb[6].mxu0 %vm38_vm1, %v21_v15  ;;  %316 = vmatmul.mubr.msk.f32.gmra.mrb[6].mxu1 %vm38_vm1, %v29_v16 }
  0xd8   :  { %v296_v18 = vpop.f32.mrb[0].mxu0  ;;  %v308_v19 = vpop.f32.mrb[0].mxu1 }
  0xd9   :  { %v163_v20 = vadd.f32 %v296_v18, %v257_v17  ;;  %v203_v21 = vadd.f32 %v308_v19, %v257_v17  ;;  %v157_v22 = vpop.f32.mrb[1].mxu0  ;;  %v197_v23 = vpop.f32.mrb[1].mxu1 }
  0xda   :  { %v158_v24 = vadd.f32 %v257_v17, %v157_v22  ;;  %v198_v25 = vadd.f32 %v257_v17, %v197_v23 }
  0xdb   :  { %238 = vst.msk [vmem:[%s477_s3 + $0x8] sm:$0xff] %vm236_vm2, %v163_v20  ;;  %246 = vst.msk [vmem:[%s477_s3 + $0x48] sm:$0xff] %vm236_vm2, %v203_v21 }
  0xdc   :  { %237 = vst.msk [vmem:[%s477_s3] sm:$0xff] %vm236_vm2, %v158_v24  ;;  %245 = vst.msk [vmem:[%s477_s3 + $0x40] sm:$0xff] %vm236_vm2, %v198_v25  ;;  %v299_v26 = vpop.f32.mrb[2].mxu0  ;;  %v311_v27 = vpop.f32.mrb[2].mxu1 }
  0xdd   :  { %v173_v28 = vadd.f32 %v299_v26, %v257_v17  ;;  %v213_v29 = vadd.f32 %v311_v27, %v257_v17  ;;  %v167_v30 = vpop.f32.mrb[3].mxu0  ;;  %v207_v31 = vpop.f32.mrb[3].mxu1 }
  0xde   :  { %v168_v32 = vadd.f32 %v257_v17, %v167_v30  ;;  %v208_v33 = vadd.f32 %v257_v17, %v207_v31 }
  0xdf   :  { %240 = vst.msk [vmem:[%s477_s3 + $0x18] sm:$0xff] %vm236_vm2, %v173_v28  ;;  %248 = vst.msk [vmem:[%s477_s3 + $0x58] sm:$0xff] %vm236_vm2, %v213_v29 }
  0xe0   :  { %239 = vst.msk [vmem:[%s477_s3 + $0x10] sm:$0xff] %vm236_vm2, %v168_v32  ;;  %247 = vst.msk [vmem:[%s477_s3 + $0x50] sm:$0xff] %vm236_vm2, %v208_v33  ;;  %v302_v34 = vpop.f32.mrb[4].mxu0  ;;  %v314_v35 = vpop.f32.mrb[4].mxu1 }
  0xe1   :  { %v183_v36 = vadd.f32 %v302_v34, %v257_v17  ;;  %v223_v37 = vadd.f32 %v314_v35, %v257_v17  ;;  %v177_v38 = vpop.f32.mrb[5].mxu0  ;;  %v217_v39 = vpop.f32.mrb[5].mxu1 }
  0xe2   :  { %v178_v40 = vadd.f32 %v257_v17, %v177_v38  ;;  %v218_v41 = vadd.f32 %v257_v17, %v217_v39 }
  0xe3   :  { %242 = vst.msk [vmem:[%s477_s3 + $0x28] sm:$0xff] %vm236_vm2, %v183_v36  ;;  %250 = vst.msk [vmem:[%s477_s3 + $0x68] sm:$0xff] %vm236_vm2, %v223_v37 }
  0xe4   :  { %241 = vst.msk [vmem:[%s477_s3 + $0x20] sm:$0xff] %vm236_vm2, %v178_v40  ;;  %249 = vst.msk [vmem:[%s477_s3 + $0x60] sm:$0xff] %vm236_vm2, %v218_v41  ;;  %v305_v42 = vpop.f32.mrb[6].mxu0  ;;  %v317_v43 = vpop.f32.mrb[6].mxu1 }
  0xe5   :  { %v193_v44 = vadd.f32 %v305_v42, %v257_v17  ;;  %v233_v45 = vadd.f32 %v317_v43, %v257_v17  ;;  %v187_v46 = vpop.f32.mrb[7].mxu0  ;;  %v227_v47 = vpop.f32.mrb[7].mxu1 }
  0xe6   :  { %v188_v48 = vadd.f32 %v257_v17, %v187_v46  ;;  %v228_v49 = vadd.f32 %v257_v17, %v227_v47 }
  0xe7   :  { %244 = vst.msk [vmem:[%s477_s3 + $0x38] sm:$0xff] %vm236_vm2, %v193_v44  ;;  %252 = vst.msk [vmem:[%s477_s3 + $0x78] sm:$0xff] %vm236_vm2, %v233_v45 }
  0xe8   :  { %243 = vst.msk [vmem:[%s477_s3 + $0x30] sm:$0xff] %vm236_vm2, %v188_v48  ;;  %251 = vst.msk [vmem:[%s477_s3 + $0x70] sm:$0xff] %vm236_vm2, %v228_v49 }

</bundles_post_ra>
